<compile_context>
chip_gen: v6e
topology: v6e:2x2x1
jax: 0.10.0
libtpu: 0.0.40
codegen_flags: <defaults>
</compile_context>

<pallas_src>
import jax
import jax.numpy as jnp
from jax.experimental import pallas as pl
from jax.experimental.pallas import tpu as pltpu


def _round_up(x, m):
    return (x + m - 1) // m * m


def _make_kernel(w, tile_r, lane):
    half = w // 2
    hoisted = (lane % w == 0)
    trl_mod = (tile_r * lane) % w      # Python int, exact
    lane_mod = lane % w

    def kernel(alpha_ref, x_ref, o_ref):
        a_r = alpha_ref[0]
        a_i = alpha_ref[1]

        if hoisted:
            # Every row starts at a flat offset that is a multiple of w, so
            # position-in-last-axis depends only on the lane index: one
            # (1, lane) alpha row, broadcast over the whole tile (hoisted).
            col = jax.lax.broadcasted_iota(jnp.int32, (1, lane), 1)
            pos = col % w
        else:
            # General case: pos = global_flat_index % w, computed via modular
            # arithmetic so it never overflows int32 for huge tensors.
            base_mod = ((pl.program_id(0) % w) * trl_mod) % w
            row = jax.lax.broadcasted_iota(jnp.int32, (tile_r, lane), 0)
            col = jax.lax.broadcasted_iota(jnp.int32, (tile_r, lane), 1)
            pos = (base_mod + (row * lane_mod) % w + col % w) % w

        alpha = jnp.where(pos < half, a_r, a_i)           # f32, (1|tile_r, lane)

        x = x_ref[...].astype(jnp.float32)                # compute in f32
        out = jnp.maximum(x, 0.0) + alpha * jnp.minimum(x, 0.0)
        o_ref[...] = out.astype(o_ref.dtype)

    return kernel


def complex_prelu(x, alpha_r, alpha_i, *, lane=1024,
                  target_tile_bytes=2 * 1024 * 1024):
    """out[..., :W//2] = PReLU_r(real half); out[..., W//2:] = PReLU_i(imag half)."""
    orig_shape = x.shape
    w = orig_shape[-1]
    assert w % 2 == 0, "last dim must be even"
    n = x.size
    itemsize = jnp.dtype(x.dtype).itemsize

    # Lane-dense slab: flatten, pad to a whole number of (8, lane) sub-tiles.
    rows = pl.cdiv(n, lane)
    rows_padded = _round_up(max(rows, 1), 8)
    n_padded = rows_padded * lane
    flat = x.reshape(-1)
    if n_padded != n:
        flat = jnp.pad(flat, (0, n_padded - n))
    x2d = flat.reshape(rows_padded, lane)

    # Row tile: ~target_tile_bytes per buffer, multiple of 8, <= rows_padded.
    budget_rows = max(8, (target_tile_bytes // (lane * itemsize)) // 8 * 8)
    tile_r = int(min(rows_padded, budget_rows))
    grid = (pl.cdiv(rows_padded, tile_r),)

    alphas = jnp.asarray([alpha_r, alpha_i], dtype=jnp.float32)

    out2d = pl.pallas_call(
        _make_kernel(w, tile_r, lane),
        out_shape=jax.ShapeDtypeStruct((rows_padded, lane), x.dtype),
        grid=grid,
        in_specs=[
            pl.BlockSpec(memory_space=pltpu.MemorySpace.SMEM),   # [alpha_r, alpha_i]
            pl.BlockSpec((tile_r, lane), lambda i: (i, 0)),      # x tile
        ],
        out_specs=pl.BlockSpec((tile_r, lane), lambda i: (i, 0)),
        input_output_aliases={1: 0},     # donate x's HBM buffer to the output
        compiler_params=pltpu.CompilerParams(
            dimension_semantics=("parallel",),
        ),
    )(alphas, x2d)

    return out2d.reshape(-1)[:n].reshape(orig_shape)


def _reference(x, alpha_r, alpha_i):
    # Pure-JAX reference matching the PyTorch module.
    half = x.shape[-1] // 2
    xr, xi = x[..., :half], x[..., half:]
    pr = jnp.where(xr >= 0, xr, alpha_r * xr)
    pi = jnp.where(xi >= 0, xi, alpha_i * xi)
    return jnp.concatenate([pr, pi], axis=-1)


if __name__ == "__main__":
    key = jax.random.PRNGKey(0)

    # Case 1: NCHW activation, torch.nn.PReLU() default weights (0.25, 0.25).
    B, C, H, W = 2, 4, 16, 16
    x = jax.random.normal(key, (B, C, H, W), dtype=jnp.float32)
    out = jax.block_until_ready(complex_prelu(x, 0.25, 0.25))
    ref = _reference(x, 0.25, 0.25)
    assert out.shape == x.shape
    assert jnp.allclose(out, ref, atol=1e-6), "mismatch vs reference (case 1)"

    # Case 2: distinct alphas and a last dim that does not divide the lane
    # width, exercising the real/imag split and the general index path.
    x2 = jax.random.normal(jax.random.PRNGKey(1), (3, 5, 7, 10), dtype=jnp.float32)
    out2 = jax.block_until_ready(complex_prelu(x2, 0.25, 0.1))
    ref2 = _reference(x2, 0.25, 0.1)
    assert out2.shape == x2.shape
    assert jnp.allclose(out2, ref2, atol=1e-6), "mismatch vs reference (case 2)"

    print("KERNEL_OK")
</pallas_src>

<mosaic_0001>
module attributes {stable_mosaic.version = 11 : i64} {
  func.func @kernel(%arg0: i32, %arg1: memref<2xf32, #tpu.memory_space<smem>>, %arg2: memref<8x1024xf32, #tpu.memory_space<vmem>>, %arg3: memref<8x1024xf32, #tpu.memory_space<vmem>>) attributes {dimension_semantics = [#tpu.dimension_semantics<parallel>], iteration_bounds = array<i64: 1>, scalar_prefetch = 0 : i64, scratch_operands = 0 : i64, tpu.core_type = #tpu.core_type<tc>, window_params = [{transform_indices = @transform_0, window_bounds = array<i64: 2>}, {transform_indices = @transform_1, window_bounds = array<i64: 8, 1024>}, {transform_indices = @transform_2, window_bounds = array<i64: 8, 1024>}]} {
    %c0 = arith.constant 0 : index
    %0 = memref.load %arg1[%c0] : memref<2xf32, #tpu.memory_space<smem>>
    %c1 = arith.constant 1 : index
    %1 = memref.load %arg1[%c1] : memref<2xf32, #tpu.memory_space<smem>>
    %2 = tpu.iota {dimensions = array<i32: 1>} : vector<1x1024xi32>
    %c16_i32 = arith.constant 16 : i32
    %c0_i32 = arith.constant 0 : i32
    %3 = arith.cmpi eq, %c16_i32, %c0_i32 : i32
    %c1_i32 = arith.constant 1 : i32
    %4 = arith.select %3, %c1_i32, %c16_i32 : i32
    %5 = vector.broadcast %4 : i32 to vector<1x1024xi32>
    %6 = arith.remsi %2, %5 : vector<1x1024xi32>
    %c0_i32_0 = arith.constant 0 : i32
    %7 = vector.broadcast %c0_i32_0 : i32 to vector<1x1024xi32>
    %8 = arith.cmpi ne, %6, %7 : vector<1x1024xi32>
    %c0_i32_1 = arith.constant 0 : i32
    %9 = vector.broadcast %c0_i32_1 : i32 to vector<1x1024xi32>
    %10 = arith.cmpi slt, %6, %9 : vector<1x1024xi32>
    %c0_i32_2 = arith.constant 0 : i32
    %11 = arith.cmpi slt, %4, %c0_i32_2 : i32
    %12 = vector.broadcast %11 : i1 to vector<1x1024xi1>
    %13 = vector.broadcast %12 : vector<1x1024xi1> to vector<1x1024xi1>
    %14 = arith.xori %10, %13 : vector<1x1024xi1>
    %15 = arith.andi %14, %8 : vector<1x1024xi1>
    %16 = vector.broadcast %4 : i32 to vector<1x1024xi32>
    %17 = arith.addi %6, %16 : vector<1x1024xi32>
    %18 = arith.select %15, %17, %6 : vector<1x1024xi1>, vector<1x1024xi32>
    %c8_i32 = arith.constant 8 : i32
    %19 = vector.broadcast %c8_i32 : i32 to vector<1x1024xi32>
    %20 = arith.cmpi slt, %18, %19 : vector<1x1024xi32>
    %21 = vector.broadcast %0 : f32 to vector<1x1024xf32>
    %22 = vector.broadcast %1 : f32 to vector<1x1024xf32>
    %23 = arith.select %20, %21, %22 : vector<1x1024xi1>, vector<1x1024xf32>
    %c0_3 = arith.constant 0 : index
    %c0_4 = arith.constant 0 : index
    %24 = vector.load %arg2[%c0_3, %c0_4] : memref<8x1024xf32, #tpu.memory_space<vmem>>, vector<8x1024xf32>
    %cst = arith.constant 0.000000e+00 : f32
    %25 = vector.broadcast %cst : f32 to vector<8x1024xf32>
    %26 = arith.maximumf %24, %25 : vector<8x1024xf32>
    %cst_5 = arith.constant 0.000000e+00 : f32
    %27 = vector.broadcast %cst_5 : f32 to vector<8x1024xf32>
    %28 = arith.minimumf %24, %27 : vector<8x1024xf32>
    %29 = vector.broadcast %23 : vector<1x1024xf32> to vector<8x1024xf32>
    %30 = arith.mulf %29, %28 : vector<8x1024xf32>
    %31 = arith.addf %26, %30 : vector<8x1024xf32>
    %c0_6 = arith.constant 0 : index
    %c0_7 = arith.constant 0 : index
    %32 = vector.load %arg3[%c0_6, %c0_7] : memref<8x1024xf32, #tpu.memory_space<vmem>>, vector<8x1024xf32>
    tpu.vector_store %arg3[%c0_6, %c0_7], %31 {strides = array<i32>} : memref<8x1024xf32, #tpu.memory_space<vmem>>, vector<8x1024xf32>,
    return
  }
  func.func @transform_0(%arg0: i32) -> i32 {
    %c0_i32 = arith.constant 0 : i32
    %c0_i32_0 = arith.constant 0 : i32
    return %c0_i32 : i32
  }
  func.func @transform_1(%arg0: i32) -> (i32, i32) {
    %c0_i32 = arith.constant 0 : i32
    %c0_i32_0 = arith.constant 0 : i32
    return %arg0, %c0_i32 : i32, i32
  }
  func.func @transform_2(%arg0: i32) -> (i32, i32) {
    %c0_i32 = arith.constant 0 : i32
    %c0_i32_0 = arith.constant 0 : i32
    return %arg0, %c0_i32 : i32, i32
  }
}

</mosaic_0001>

<bundles_post_ra>
// kernel: tpu_custom_call.1
= control target key start
LH: loop header
LB: loop body
LE: loop exit
PB: predicated region body
PF: predicated region fallthrough
CT: control target
= control target key end

     0   :  { %7 = vsyncpa [#allocation5], 0  ;;  %s315_s0 = inlined_call_operand.vmem [shape: f32[2], index: 0, kind: input, shape index: {}]   ;;  %s316_s1 = inlined_call_operand.hbm [shape: f32[8,1024], index: 1, kind: input, shape index: {}, may-alias: {1,2}]   ;;  %s317_s2 = inlined_call_operand.hbm [shape: f32[8,1024], index: 2, kind: output, shape index: {}, may-alias: {1,2}]  }
   0x1   :  { %8 = vsyncpa [#allocation3], 0 }
   0x2   :  { %9 = vsyncpa [#allocation4], 0  ;;  %s16_s11 = sshll.u32 %s315_s0, 4  ;;  %s17_s11 = int_to_ptr.vmem [resolvable:$true] %s16_s11 }
   0x3   :  { %s230_s12 = scalar_lea.vmem %s17_s11, 16  ;;  %p235_p1 = scmp.lt.s32.totalorder %s17_s11, %s17_s11 }
   0x4   :  { %p231_p0 = scmp.ne.s32.totalorder %s17_s11, %s230_s12  ;;  %p236_p2 = scmp.lt.s32.totalorder %s230_s12, %s230_s12 }
   0x6   :  { %p237_p3 = por %p236_p2, %p235_p1 }
   0x8   :  { %p238_p4 = pnand %p237_p3, %p231_p0 }
   0xa   :  { %241 = shalt.err (!%p238_p4)
}
   0xb   :  { %s288_s13 = smov [#allocation2]   ;;  %s289_s14 = smov [#allocation6]  }
   0xc   :  { %19 = dma.vmem_to_smem %s17_s11, 16, %s288_s13, [#allocation5]  }
   0xd   :  { %s26_s15 = sshll.u32 %s289_s14, 4  ;;  %s27_s15 = int_to_ptr.vmem [resolvable:$true] %s26_s15 }
   0xe   :  { %s250_s16 = scalar_lea.vmem %s27_s15, 1024  ;;  %p255_p6 = scmp.lt.s32.totalorder %s27_s15, %s27_s15 }
   0xf   :  { %p251_p5 = scmp.ne.s32.totalorder %s27_s15, %s250_s16  ;;  %p256_p7 = scmp.lt.s32.totalorder %s250_s16, %s250_s16 }
  0x11   :  { %p257_p8 = por %p256_p7, %p255_p6 }
  0x13   :  { %p258_p9 = pnand %p257_p8, %p251_p5 }
  0x15   :  { %261 = shalt.err (!%p258_p9)
}
  0x16   :  { %29 = dma.hbm_to_vmem [thread:$0]  %s316_s1, 1024, %s27_s15, [#allocation3]  }
  0x17   :  { %282 = dma.done.wait [#allocation5], 16  }
  0x18   :  { %283 = vsyncadd [#allocation5], 4294967280 }
  0x19   :  { %284 = dma.done.wait [#allocation3], 1024  }
  0x1a   :  { %285 = vsyncadd [#allocation3], 4294966272 }
  0x1b   :  { %36 = sfence }
  0x1c   :  { %s37_s18 = sld [smem:[#allocation2]]  ;;  %v39_v0 = vlaneseq  ;;  %v162_v1 = vld [vmem:[#allocation6] sm:$0xff]  ;;  %v163_v2 = vld [vmem:[#allocation6 + $0x8] sm:$0xff]  ;;  %v164_v3 = vld [vmem:[#allocation6 + $0x10] sm:$0xff]  ;;  %s290_s1 = smov [#allocation7]  }
  0x1d   :  { %s226_s19 = sld [smem:[#allocation2 + $0x1]]  ;;  %v170_v4 = vmax.f32 %v162_v1, 0.0  ;;  %v178_v5 = vmin.f32 %v162_v1, 0.0  ;;  %v171_v6 = vmax.f32 %v163_v2, 0.0  ;;  %v179_v7 = vmin.f32 %v163_v2, 0.0  ;;  %v165_v11 = vld [vmem:[#allocation6 + $0x18] sm:$0xff] }
  0x1e   :  { %v40_v8 = vand.u32 127, %v39_v0  ;;  %v172_v9 = vmax.f32 %v164_v3, 0.0  ;;  %v180_v10 = vmin.f32 %v164_v3, 0.0  ;;  %v166_v12 = vld [vmem:[#allocation6 + $0x20] sm:$0xff]  ;;  %v167_v13 = vld [vmem:[#allocation6 + $0x28] sm:$0xff]  ;;  %v173_v14 = vmax.f32 %v165_v11, 0.0 }
  0x1f   :  { %v181_v15 = vmin.f32 %v165_v11, 0.0  ;;  %v174_v16 = vmax.f32 %v166_v12, 0.0  ;;  %v182_v17 = vmin.f32 %v166_v12, 0.0  ;;  %v175_v24 = vmax.f32 %v167_v13, 0.0  ;;  %v168_v44 = vld [vmem:[#allocation6 + $0x30] sm:$0xff]  ;;  %v169_v52 = vld [vmem:[#allocation6 + $0x38] sm:$0xff] }
  0x20   :  { %v52_v18 = vand.u32 15, %v40_v8  ;;  %v41_v19 = vadd.s32 128, %v40_v8  ;;  %v42_v20 = vadd.s32 256, %v40_v8  ;;  %v43_v21 = vadd.s32 384, %v40_v8  ;;  %s216_s20 = sshll.u32 %s290_s1, 4  ;;  %s217_s20 = int_to_ptr.vmem [resolvable:$true] %s216_s20 }
  0x21   :  { %v44_v22 = vadd.s32 512, %v40_v8  ;;  %v45_v23 = vadd.s32 640, %v40_v8  ;;  %v183_v25 = vmin.f32 %v167_v13, 0.0  ;;  %v46_v34 = vadd.s32 768, %v40_v8  ;;  %s262_s21 = scalar_lea.vmem %s217_s20, 1024  ;;  %p267_p11 = scmp.lt.s32.totalorder %s217_s20, %s217_s20 }
  0x22   :  { %vm144_vm0 = vcmp.lt.s32.totalorder %v52_v18, 8  ;;  %v152_v26 = vstv %s37_s18  ;;  %v59_v27 = vand.u32 15, %v41_v19  ;;  %v66_v28 = vand.u32 15, %v42_v20  ;;  %p263_p10 = scmp.ne.s32.totalorder %s217_s20, %s262_s21  ;;  %p268_p12 = scmp.lt.s32.totalorder %s262_s21, %s262_s21 }
  0x23   :  { %v153_v29 = vstv %s226_s19  ;;  %v73_v30 = vand.u32 15, %v43_v21  ;;  %v80_v31 = vand.u32 15, %v44_v22  ;;  %v87_v32 = vand.u32 15, %v45_v23 }
  0x24   :  { %v154_v33 = vsel %vm144_vm0, %v152_v26, %v153_v29  ;;  %vm145_vm1 = vcmp.lt.s32.totalorder %v59_v27, 8  ;;  %vm146_vm2 = vcmp.lt.s32.totalorder %v66_v28, 8  ;;  %v94_v51 = vand.u32 15, %v46_v34  ;;  %p269_p13 = por %p268_p12, %p267_p11 }
  0x25   :  { %v186_v35 = vmul.f32 %v178_v5, %v154_v33  ;;  %v155_v36 = vsel %vm145_vm1, %v152_v26, %v153_v29  ;;  %v156_v37 = vsel %vm146_vm2, %v152_v26, %v153_v29  ;;  %vm147_vm3 = vcmp.lt.s32.totalorder %v73_v30, 8 }
  0x26   :  { %v187_v38 = vmul.f32 %v179_v7, %v155_v36  ;;  %v188_v39 = vmul.f32 %v180_v10, %v156_v37  ;;  %v157_v40 = vsel %vm147_vm3, %v152_v26, %v153_v29  ;;  %vm148_vm4 = vcmp.lt.s32.totalorder %v80_v31, 8  ;;  %p270_p0 = pnand %p269_p13, %p263_p10 }
  0x27   :  { %v194_v41 = vadd.f32 %v186_v35, %v170_v4  ;;  %v189_v42 = vmul.f32 %v181_v15, %v157_v40  ;;  %v158_v43 = vsel %vm148_vm4, %v152_v26, %v153_v29  ;;  %vm149_vm5 = vcmp.lt.s32.totalorder %v87_v32, 8 }
  0x28   :  { %v195_v45 = vadd.f32 %v187_v38, %v171_v6  ;;  %v196_v46 = vadd.f32 %v188_v39, %v172_v9  ;;  %v190_v47 = vmul.f32 %v182_v17, %v158_v43  ;;  %v159_v48 = vsel %vm149_vm5, %v152_v26, %v153_v29 }
  0x29   :  { %202 = vst [vmem:[#allocation7] sm:$0xff] %v194_v41  ;;  %v197_v49 = vadd.f32 %v189_v42, %v173_v14  ;;  %v191_v50 = vmul.f32 %v183_v25, %v159_v48  ;;  %v184_v54 = vmin.f32 %v168_v44, 0.0  ;;  %v47_v55 = vadd.s32 896, %v40_v8 }
  0x2a   :  { %203 = vst [vmem:[#allocation7 + $0x8] sm:$0xff] %v195_v45  ;;  %204 = vst [vmem:[#allocation7 + $0x10] sm:$0xff] %v196_v46  ;;  %v198_v53 = vadd.f32 %v190_v47, %v174_v16  ;;  %vm150_vm6 = vcmp.lt.s32.totalorder %v94_v51, 8  ;;  %v176_v57 = vmax.f32 %v168_v44, 0.0  ;;  %v185_v60 = vmin.f32 %v169_v52, 0.0 }
  0x2b   :  { %205 = vst [vmem:[#allocation7 + $0x18] sm:$0xff] %v197_v49  ;;  %v199_v56 = vadd.f32 %v191_v50, %v175_v24  ;;  %v160_v58 = vsel %vm150_vm6, %v152_v26, %v153_v29  ;;  %v101_v59 = vand.u32 15, %v47_v55  ;;  %v177_v62 = vmax.f32 %v169_v52, 0.0 }
  0x2c   :  { %206 = vst [vmem:[#allocation7 + $0x20] sm:$0xff] %v198_v53  ;;  %v192_v61 = vmul.f32 %v184_v54, %v160_v58 }
  0x2d   :  { %207 = vst [vmem:[#allocation7 + $0x28] sm:$0xff] %v199_v56  ;;  %vm151_vm7 = vcmp.lt.s32.totalorder %v101_v59, 8 }
  0x2e   :  { %v200_v63 = vadd.f32 %v192_v61, %v176_v57  ;;  %v161_v0 = vsel %vm151_vm7, %v152_v26, %v153_v29 }
  0x2f   :  { %v193_v1 = vmul.f32 %v185_v60, %v161_v0 }
  0x30   :  { %208 = vst [vmem:[#allocation7 + $0x30] sm:$0xff] %v200_v63 }
  0x31   :  { %v201_v2 = vadd.f32 %v193_v1, %v177_v62 }
  0x33   :  { %209 = vst [vmem:[#allocation7 + $0x38] sm:$0xff] %v201_v2 }
  0x34   :  { %273 = shalt.err (!%p270_p0)
}
  0x35   :  { %219 = dma.vmem_to_hbm [thread:$0]  %s217_s20, 1024, %s317_s2, [#allocation4]  }
  0x36   :  { %286 = dma.done.wait [#allocation4], 1024  }
  0x37   :  { %287 = vsyncadd [#allocation4], 4294966272 }
  0x38   :  { %223 = vsyncpa [#allocation3], 1 }
  0x39   :  { %224 = vsyncpa [#allocation4], 1 }
  0x3a   :  { %225 = vsyncpa [#allocation5], 1 }

</bundles_post_ra>
